<compile_context>
chip_gen: v5e
topology: v5e:2x2
jax: 0.10.0
libtpu: 0.0.40
codegen_flags: <defaults>
</compile_context>

<pallas_src>
import jax
import jax.numpy as jnp
from jax.experimental import pallas as pl
from jax.experimental.pallas import tpu as pltpu


def _head_kernel(h_ref, w1_ref, b1_ref, w2_ref, wout_ref, bout_ref, logits_ref):
    """One grid step == TB batch elements.

    h_ref:    (TB, S, D)   last-layer hidden states for this batch tile
    w1_ref:   (D, A)       attention Linear #1 weight
    b1_ref:   (1, A)       attention Linear #1 bias
    w2_ref:   (1, A)       attention Linear #2 weight, stored as a row vector
    wout_ref: (D, C6P)     six class heads stacked + zero-padded to 128 lanes
    bout_ref: (1, C6P)
    logits_ref: (TB, C6P)  output
    """
    tb, s, d = h_ref.shape
    h3 = h_ref[...]                                   # (TB, S, D)
    # Tile-aligned merge of the leading dims (S % 8 == 0, D % 128 == 0):
    h2 = h3.reshape(tb * s, d)                        # (TB*S, D)

    # attention = Linear(D, A) -> Tanh
    a = jnp.tanh(
        jnp.dot(h2, w1_ref[...], preferred_element_type=jnp.float32)
        + b1_ref[...])                                # (TB*S, A)

    # Linear(A, 1) as a lane reduction (XLU) instead of an N=1 MXU matmul.
    # The b2 bias is omitted: softmax is shift invariant, so it is a no-op.
    sc = jnp.sum(a * w2_ref[...], axis=-1, keepdims=True)   # (TB*S, 1)
    sc3 = sc.reshape(tb, s, 1)                               # (TB, S, 1)

    # softmax along the sequence axis (torch Softmax(dim=1) on [B, S, 1])
    m = jnp.max(sc3, axis=1, keepdims=True)                  # (TB, 1, 1)
    e = jnp.exp(sc3 - m)                                     # (TB, S, 1)
    w = e * pl.reciprocal(jnp.sum(e, axis=1, keepdims=True), approx=True)

    # context_vector = sum_seq(weights * hidden)              -> (TB, D)
    ctx = jnp.sum(w * h3, axis=1)

    # six classification heads fused into one matmul: (TB, D) @ (D, C6P)
    logits = (jnp.dot(ctx, wout_ref[...], preferred_element_type=jnp.float32)
              + bout_ref[...])                                # (TB, C6P)
    logits_ref[...] = logits.astype(logits_ref.dtype)


def iqiy_head(hidden, w1, b1, w2_row, wout, bout, *, tb=16):
    """hidden: [B, S, D] float32.  Returns logits [B, C6P] (padded lanes kept).

    tb: batch tile.  Pick tb so tb*S is a multiple of 128 (256 on v6e/v7x) and
    the (tb, S, D) block (double-buffered) fits VMEM; tb must be a multiple
    of 8 for the lane-dense output block.
    """
    B, S, D = hidden.shape
    A = w1.shape[1]
    C6P = wout.shape[1]      # already padded to a multiple of 128 by the caller

    # Pad the batch to a multiple of the batch tile; padded rows are sliced off.
    Bp = ((B + tb - 1) // tb) * tb
    if Bp != B:
        hidden = jnp.pad(hidden, ((0, Bp - B), (0, 0), (0, 0)))

    out = pl.pallas_call(
        _head_kernel,
        out_shape=jax.ShapeDtypeStruct((Bp, C6P), jnp.float32),
        grid_spec=pltpu.PrefetchScalarGridSpec(
            num_scalar_prefetch=0,
            grid=(Bp // tb,),
            in_specs=[
                pl.BlockSpec((tb, S, D), lambda b: (b, 0, 0)),
                pl.BlockSpec((D, A), lambda b: (0, 0)),
                pl.BlockSpec((1, A), lambda b: (0, 0)),
                pl.BlockSpec((1, A), lambda b: (0, 0)),
                pl.BlockSpec((D, C6P), lambda b: (0, 0)),
                pl.BlockSpec((1, C6P), lambda b: (0, 0)),
            ],
            out_specs=pl.BlockSpec((tb, C6P), lambda b: (b, 0)),
        ),
        compiler_params=pltpu.CompilerParams(
            dimension_semantics=("parallel",)),
    )(hidden, w1, b1, w2_row, wout, bout)
    return out[:B]


def _xavier(key, shape):
    fan_in, fan_out = shape[0], shape[1]
    limit = jnp.sqrt(6.0 / (fan_in + fan_out))
    return jax.random.uniform(key, shape, jnp.float32, -limit, limit)


class IQIYModelLitePallas:
    """Synthetic, deterministic re-implementation of IQIYModelLite's forward."""

    EMO_KEYS = ("love", "joy", "fright", "anger", "fear", "sorrow")

    def __init__(self, n_classes, dim, att_hidden, vocab_size, key):
        ks = jax.random.split(key, 10)
        self.dim = dim
        self.n_classes = n_classes
        self.c6 = 6 * n_classes
        self.c6_pad = ((self.c6 + 127) // 128) * 128      # lane-dense output

        # stand-in for the BERT encoder: a deterministic embedding table
        self.emb = 0.02 * jax.random.normal(ks[0], (vocab_size, dim), jnp.float32)

        # attention pooling head
        self.w1 = _xavier(ks[1], (dim, att_hidden))
        self.b1 = jnp.zeros((1, att_hidden), jnp.float32)
        # Linear(att_hidden, 1) weight stored as a (1, A) row vector so the
        # kernel computes it as a lane reduction.  Its bias is dropped
        # (softmax shift invariance => exact same forward output).
        self.w2 = _xavier(ks[2], (1, att_hidden))

        # six emotion heads stacked as one [dim, 6*n_classes] weight, zero
        # padded along the output axis up to a multiple of 128 lanes.
        head_ws = [_xavier(ks[3 + i], (dim, n_classes)) for i in range(6)]
        wout = jnp.concatenate(head_ws, axis=1)
        bout = jnp.zeros((1, self.c6), jnp.float32)
        pad = self.c6_pad - self.c6
        self.wout = jnp.pad(wout, ((0, 0), (0, pad)))
        self.bout = jnp.pad(bout, ((0, 0), (0, pad)))

    def __call__(self, input_ids, attention_mask):
        # --- stand-in "base" model (glue, plain JAX) ---
        # TODO(synk): real BertModel forward (pretrained transformer stack) is
        #             not reproducible without a checkpoint.
        del attention_mask  # only consumed inside the real BERT encoder
        hidden = self.emb[input_ids]          # [B, S, D] == hidden_states[-1]

        # --- fused Pallas head kernel ---
        logits = iqiy_head(hidden, self.w1, self.b1, self.w2,
                           self.wout, self.bout)          # [B, C6_pad]

        C = self.n_classes
        return {k: logits[:, i * C:(i + 1) * C]
                for i, k in enumerate(self.EMO_KEYS)}


def _reference_logits(model, input_ids):
    """Pure-JAX reference of the head (for correctness checking)."""
    hidden = model.emb[input_ids]                               # [B, S, D]
    a = jnp.tanh(hidden @ model.w1 + model.b1)                  # [B, S, A]
    s = jnp.sum(a * model.w2, axis=-1, keepdims=True)           # [B, S, 1]
    w = jax.nn.softmax(s, axis=1)                               # [B, S, 1]
    ctx = jnp.sum(w * hidden, axis=1)                           # [B, D]
    return ctx @ model.wout[:, :model.c6] + model.bout[:, :model.c6]


if __name__ == "__main__":
    # Small demo shapes: TB=16 batch tile -> TB*S = 128 (MXU/lane aligned),
    # grid = (2,) so both v7x TensorCores can be used via the parallel axis.
    B, S, D, A, C, VOCAB = 32, 8, 128, 128, 8, 100

    key = jax.random.PRNGKey(0)
    k_model, k_ids = jax.random.split(key)

    model = IQIYModelLitePallas(n_classes=C, dim=D, att_hidden=A,
                                vocab_size=VOCAB, key=k_model)

    input_ids = jax.random.randint(k_ids, (B, S), 0, VOCAB, dtype=jnp.int32)
    attention_mask = jnp.ones((B, S), jnp.int32)

    out = model(input_ids, attention_mask)
    jax.block_until_ready(out)

    assert set(out.keys()) == set(IQIYModelLitePallas.EMO_KEYS)
    assert all(v.shape == (B, C) for v in out.values())

    # correctness check against the pure-JAX reference
    got = jnp.concatenate([out[k] for k in IQIYModelLitePallas.EMO_KEYS], axis=1)
    ref = _reference_logits(model, input_ids)
    err = float(jnp.max(jnp.abs(got - ref)))
    assert jnp.allclose(got, ref, rtol=2e-2, atol=2e-3), f"max abs err {err}"

    print("KERNEL_OK")
</pallas_src>

<mosaic_0001>
module attributes {stable_mosaic.version = 11 : i64} {
  func.func @_head_kernel(%arg0: i32, %arg1: memref<16x8x128xf32, #tpu.memory_space<vmem>>, %arg2: memref<128x128xf32, #tpu.memory_space<vmem>>, %arg3: memref<1x128xf32, #tpu.memory_space<vmem>>, %arg4: memref<1x128xf32, #tpu.memory_space<vmem>>, %arg5: memref<128x128xf32, #tpu.memory_space<vmem>>, %arg6: memref<1x128xf32, #tpu.memory_space<vmem>>, %arg7: memref<16x128xf32, #tpu.memory_space<vmem>>) attributes {dimension_semantics = [#tpu.dimension_semantics<parallel>], iteration_bounds = array<i64: 2>, scalar_prefetch = 0 : i64, scratch_operands = 0 : i64, tpu.core_type = #tpu.core_type<tc>, window_params = [{transform_indices = @transform_0, window_bounds = array<i64: 16, 8, 128>}, {pipeline_mode = #tpu.pipeline_mode<synchronous>, transform_indices = @transform_1, window_bounds = array<i64: 128, 128>}, {pipeline_mode = #tpu.pipeline_mode<synchronous>, transform_indices = @transform_2, window_bounds = array<i64: 1, 128>}, {pipeline_mode = #tpu.pipeline_mode<synchronous>, transform_indices = @transform_3, window_bounds = array<i64: 1, 128>}, {pipeline_mode = #tpu.pipeline_mode<synchronous>, transform_indices = @transform_4, window_bounds = array<i64: 128, 128>}, {pipeline_mode = #tpu.pipeline_mode<synchronous>, transform_indices = @transform_5, window_bounds = array<i64: 1, 128>}, {transform_indices = @transform_6, window_bounds = array<i64: 16, 128>}]} {
    %c0 = arith.constant 0 : index
    %c0_0 = arith.constant 0 : index
    %c0_1 = arith.constant 0 : index
    %0 = vector.load %arg1[%c0, %c0_0, %c0_1] : memref<16x8x128xf32, #tpu.memory_space<vmem>>, vector<16x8x128xf32>
    %1 = vector.shape_cast %0 : vector<16x8x128xf32> to vector<128x128xf32>
    %c0_2 = arith.constant 0 : index
    %c0_3 = arith.constant 0 : index
    %2 = vector.load %arg2[%c0_2, %c0_3] : memref<128x128xf32, #tpu.memory_space<vmem>>, vector<128x128xf32>
    %cst = arith.constant dense<0.000000e+00> : vector<128x128xf32>
    %3 = tpu.matmul %1, %2, %cst {dimension_numbers = #tpu.dot_dimension_numbers<[1], [0], [0], [1], [0, 0, 1, 1], [], []>} : vector<128x128xf32>, vector<128x128xf32>, vector<128x128xf32> -> vector<128x128xf32>
    %c0_4 = arith.constant 0 : index
    %c0_5 = arith.constant 0 : index
    %4 = vector.load %arg3[%c0_4, %c0_5] : memref<1x128xf32, #tpu.memory_space<vmem>>, vector<1x128xf32>
    %5 = vector.broadcast %4 : vector<1x128xf32> to vector<128x128xf32>
    %6 = arith.addf %3, %5 : vector<128x128xf32>
    %7 = math.tanh %6 : vector<128x128xf32>
    %c0_6 = arith.constant 0 : index
    %c0_7 = arith.constant 0 : index
    %8 = vector.load %arg4[%c0_6, %c0_7] : memref<1x128xf32, #tpu.memory_space<vmem>>, vector<1x128xf32>
    %9 = vector.broadcast %8 : vector<1x128xf32> to vector<128x128xf32>
    %10 = arith.mulf %7, %9 : vector<128x128xf32>
    %cst_8 = arith.constant dense<0.000000e+00> : vector<128xf32>
    %11 = vector.multi_reduction <add>, %10, %cst_8 [1] : vector<128x128xf32> to vector<128xf32>
    %12 = vector.shape_cast %11 : vector<128xf32> to vector<128x1xf32>
    %13 = vector.shape_cast %12 : vector<128x1xf32> to vector<16x8x1xf32>
    %cst_9 = arith.constant dense<0xFF800000> : vector<16x1xf32>
    %14 = vector.multi_reduction <maximumf>, %13, %cst_9 [1] : vector<16x8x1xf32> to vector<16x1xf32>
    %15 = vector.shape_cast %14 : vector<16x1xf32> to vector<16x1x1xf32>
    %16 = vector.broadcast %15 : vector<16x1x1xf32> to vector<16x8x1xf32>
    %17 = arith.subf %13, %16 : vector<16x8x1xf32>
    %18 = math.exp %17 : vector<16x8x1xf32>
    %cst_10 = arith.constant dense<0.000000e+00> : vector<16x1xf32>
    %19 = vector.multi_reduction <add>, %18, %cst_10 [1] : vector<16x8x1xf32> to vector<16x1xf32>
    %20 = vector.shape_cast %19 : vector<16x1xf32> to vector<16x1x1xf32>
    %21 = tpu.reciprocal %20 {approx = true} : vector<16x1x1xf32> -> vector<16x1x1xf32>
    %22 = vector.broadcast %21 : vector<16x1x1xf32> to vector<16x8x1xf32>
    %23 = arith.mulf %18, %22 : vector<16x8x1xf32>
    %24 = vector.broadcast %23 : vector<16x8x1xf32> to vector<16x8x128xf32>
    %25 = arith.mulf %24, %0 : vector<16x8x128xf32>
    %cst_11 = arith.constant dense<0.000000e+00> : vector<16x128xf32>
    %26 = vector.multi_reduction <add>, %25, %cst_11 [1] : vector<16x8x128xf32> to vector<16x128xf32>
    %c0_12 = arith.constant 0 : index
    %c0_13 = arith.constant 0 : index
    %27 = vector.load %arg5[%c0_12, %c0_13] : memref<128x128xf32, #tpu.memory_space<vmem>>, vector<128x128xf32>
    %cst_14 = arith.constant dense<0.000000e+00> : vector<16x128xf32>
    %28 = tpu.matmul %26, %27, %cst_14 {dimension_numbers = #tpu.dot_dimension_numbers<[1], [0], [0], [1], [0, 0, 1, 1], [], []>} : vector<16x128xf32>, vector<128x128xf32>, vector<16x128xf32> -> vector<16x128xf32>
    %c0_15 = arith.constant 0 : index
    %c0_16 = arith.constant 0 : index
    %29 = vector.load %arg6[%c0_15, %c0_16] : memref<1x128xf32, #tpu.memory_space<vmem>>, vector<1x128xf32>
    %30 = vector.broadcast %29 : vector<1x128xf32> to vector<16x128xf32>
    %31 = arith.addf %28, %30 : vector<16x128xf32>
    %c0_17 = arith.constant 0 : index
    %c0_18 = arith.constant 0 : index
    %32 = vector.load %arg7[%c0_17, %c0_18] : memref<16x128xf32, #tpu.memory_space<vmem>>, vector<16x128xf32>
    tpu.vector_store %arg7[%c0_17, %c0_18], %31 {strides = array<i32>} : memref<16x128xf32, #tpu.memory_space<vmem>>, vector<16x128xf32>,
    return
  }
  func.func @transform_0(%arg0: i32) -> (i32, i32, i32) {
    %c0_i32 = arith.constant 0 : i32
    %c0_i32_0 = arith.constant 0 : i32
    %c0_i32_1 = arith.constant 0 : i32
    return %arg0, %c0_i32, %c0_i32_0 : i32, i32, i32
  }
  func.func @transform_1(%arg0: i32) -> (i32, i32) {
    %c0_i32 = arith.constant 0 : i32
    %c0_i32_0 = arith.constant 0 : i32
    %c0_i32_1 = arith.constant 0 : i32
    return %c0_i32, %c0_i32_0 : i32, i32
  }
  func.func @transform_2(%arg0: i32) -> (i32, i32) {
    %c0_i32 = arith.constant 0 : i32
    %c0_i32_0 = arith.constant 0 : i32
    %c0_i32_1 = arith.constant 0 : i32
    return %c0_i32, %c0_i32_0 : i32, i32
  }
  func.func @transform_3(%arg0: i32) -> (i32, i32) {
    %c0_i32 = arith.constant 0 : i32
    %c0_i32_0 = arith.constant 0 : i32
    %c0_i32_1 = arith.constant 0 : i32
    return %c0_i32, %c0_i32_0 : i32, i32
  }
  func.func @transform_4(%arg0: i32) -> (i32, i32) {
    %c0_i32 = arith.constant 0 : i32
    %c0_i32_0 = arith.constant 0 : i32
    %c0_i32_1 = arith.constant 0 : i32
    return %c0_i32, %c0_i32_0 : i32, i32
  }
  func.func @transform_5(%arg0: i32) -> (i32, i32) {
    %c0_i32 = arith.constant 0 : i32
    %c0_i32_0 = arith.constant 0 : i32
    %c0_i32_1 = arith.constant 0 : i32
    return %c0_i32, %c0_i32_0 : i32, i32
  }
  func.func @transform_6(%arg0: i32) -> (i32, i32) {
    %c0_i32 = arith.constant 0 : i32
    %c0_i32_0 = arith.constant 0 : i32
    return %arg0, %c0_i32 : i32, i32
  }
}

</mosaic_0001>

<bundles_post_ra>
// kernel: tpu_custom_call.1
= control target key start
LH: loop header
LB: loop body
LE: loop exit
PB: predicated region body
PF: predicated region fallthrough
CT: control target
= control target key end

     0   :  { %11 = vsyncpa [#allocation3], 0  ;;  %s1913_s0 = inlined_call_operand.hbm [shape: f32[32,8,128], index: 0, kind: input, shape index: {}]   ;;  %s1914_s1 = inlined_call_operand.hbm [shape: f32[128,128], index: 1, kind: input, shape index: {}]   ;;  %s1915_s2 = inlined_call_operand.vmem [shape: f32[1,128], index: 2, kind: input, shape index: {}]   ;;  %s1916_s3 = inlined_call_operand.vmem [shape: f32[1,128], index: 3, kind: input, shape index: {}]   ;;  %s1917_s4 = inlined_call_operand.hbm [shape: f32[128,128], index: 4, kind: input, shape index: {}]   ;;  %s1918_s5 = inlined_call_operand.vmem [shape: f32[1,128], index: 5, kind: input, shape index: {}]   ;;  %s1919_s6 = inlined_call_operand.hbm [shape: f32[32,128], index: 6, kind: output, shape index: {}]  }
   0x1   :  { %13 = vsyncpa [#allocation3 + $0x1], 0 }
   0x2   :  { %14 = vsyncpa [#allocation6], 0 }
   0x3   :  { %15 = vsyncpa [#allocation4], 0 }
   0x4   :  { %17 = vsyncpa [#allocation4 + $0x1], 0  ;;  %s1483_s21 = smov 0   ;;  %s1485_s22 = smov 0  }
   0x5   :  { %s1487_s23 = smov 0   ;;  %s1489_s24 = smov 0  }
   0x6 LB: > { %s1504_s25 = sadd.s32 4294967295, %s1440_s24   ;;  %s1052_s26 = sadd.s32 4294967294, %s1440_s24   ;;  %s1440_s24 = sphi %s1489_s24, %s1933_s24   ;;  %s1436_s23 = sphi %s1487_s23, %s1932_s23   ;;  %s1432_s22 = sphi %s1485_s22, %s1931_s22   ;;  %s1428_s21 = sphi %s1483_s21, %s1930_s21  }
   0x7   : > { %p43_p0 = scmp.ne.s32.totalorder %s1432_s22, %s1428_s21  ;;  %p44_p1 = scmp.eq.s32.totalorder %s1504_s25, 0 }
   0x8   : > { %p172_p2 = scmp.eq.s32.totalorder %s1504_s25, 1  ;;  %p178_p3 = scmp.eq.s32.totalorder %s1052_s26, 1 }
   0x9   : > { %p1513_p4 = por %p44_p1, %p43_p0  ;;  %p1053_p5 = scmp.ge.s32.totalorder %s1440_s24, 1 }
   0xa   : > { %p1518_p6 = por %p178_p3, %p43_p0  ;;  %p185_p7 = scmp.lt.s32.totalorder %s1440_s24, 3 }
   0xb   : > { %s196_s7 = sshll.u32 %s1914_s1, 4  ;;  %s1442_s9 = smov [#allocation5]   ;;  %s197_s7 = int_to_ptr.hbm [resolvable:$true] %s196_s7 }
   0xc   : > { %p1526_p8 = pnand %p1053_p5, %p185_p7  ;;  %s198_s10 = sshll.u32 %s1442_s9, 4  ;;  %s199_s10 = int_to_ptr.vmem [resolvable:$true] %s198_s10 }
   0xd   : > { %s216_s13 = sshll.u32 %s1917_s4, 4  ;;  %s1920_s14 = smov 128   ;;  %s217_s13 = int_to_ptr.hbm [resolvable:$true] %s216_s13 }
   0xe   : > { %p1116_p9 = pneg %p1526_p8  ;;  %s1921_s15 = smov 8  }
   0xf   : > { %s1445_s16 = smov [#allocation7]   ;;  %s1545_s18 = sadd.s32 1, %s1440_s24  }
  0x10   : > { %p1117_p10 = pnand %p1116_p9, %p44_p1  ;;  %s218_s17 = sshll.u32 %s1445_s16, 4  ;;  %s219_s17 = int_to_ptr.vmem [resolvable:$true] %s218_s17 }
  0x11   : > { %s30_s19 = sadd.s32 1, %s1436_s23  ;;  %s27_s20 = ssub.s32 %s1440_s24, %s1545_s18 }
  0x12   : > { %1119 = dma.hbm_to_vmem [thread:$0]  (!%p1117_p10), %s197_s7, 2048, %s199_s10, [#allocation6], %s1920_s14, %s1920_s14, %s1921_s15  }
  0x13   : > { %1122 = dma.hbm_to_vmem [thread:$0]  (!%p1117_p10), %s217_s13, 2048, %s219_s17, [#allocation6], %s1920_s14, %s1920_s14, %s1921_s15  }
  0x14   : > { %p37_p12 = scmp.ne.s32.totalorder %s1436_s23, %s1432_s22  ;;  %p28_p13 = scmp.eq.s32.totalorder %s27_s20, 0 }
  0x15   : > { %p38_p0 = scmp.eq.s32.totalorder %s1440_s24, 0  ;;  %p1133_p5 = scmp.lt.s32.totalorder %s1440_s24, 2 }
  0x16   : > { %p1555_p3 = por %p172_p2, %p37_p12  ;;  %s235_s30 = sand.u32 1, %s1436_s23  }
  0x17   : > { %s1561_s29 = scalar_select %p28_p13, %s1436_s23, %s30_s19  }
  0x18   : > { %p39_p7 = por %p38_p0, %p37_p12  ;;  %s1057_s7 = sshll.u32 %s235_s30, 7 }
  0x19   : > { %s1070_s9 = sshll.u32 %s1440_s24, 7  ;;  %s239_s13 = scalar_lea.vmem [#allocation2], %s1057_s7 }
  0x1a   : > { %s244_s12 = scalar_lea.hbm %s1913_s0, %s1070_s9  ;;  %s247_s16 = sshll.u32 %s239_s13, 4  ;;  %s248_s16 = int_to_ptr.vmem [resolvable:$true] %s247_s16 }
  0x1b   : > { %s245_s17 = sshll.u32 %s244_s12, 4  ;;  %p1568_p2 = pnand %p1133_p5, %p39_p7  ;;  %s246_s17 = int_to_ptr.hbm [resolvable:$true] %s245_s17 }
  0x1c   : > { %s236_s19 = scalar_lea.sflag [#allocation3], %s235_s30  ;;  %s1340_s14 = sshra.s32 %s246_s17, 4  ;;  %s1341_s14 = int_to_ptr.hbm [resolvable:$true] %s1340_s14 }
  0x1d   : > { %s1342_s15 = scalar_lea.hbm %s1341_s14, 128  ;;  %p1344_p10 = pneg %p1568_p2 }
  0x1e   : > { %p1343_p9 = scmp.ne.s32.totalorder %s1341_s14, %s1342_s15  ;;  %s1347_s10 = scalar_lea.hbm %s1913_s0, 256 }
  0x1f   : > { %p1348_p0 = scmp.lt.s32.totalorder %s1341_s14, %s1913_s0  ;;  %p1349_p5 = scmp.lt.s32.totalorder %s1347_s10, %s1342_s15 }
  0x20   : > { %p1345_p12 = pnand %p1344_p10, %p1343_p9 }
  0x21   : > { %p1350_p7 = por %p1349_p5, %p1348_p0 }
  0x22   : > { %p1346_p13 = pneg %p1345_p12 }
  0x24   : > { %p1351_p11 = pnand %p1350_p7, %p1346_p13 }
  0x26   : > { %1354 = shalt.err (!%p1351_p11)
}
  0x27   : > { %s1927_s30 = smov 8   ;;  %s1928_s13 = smov 128  }
  0x28   : > { %1126 = dma.hbm_to_vmem [thread:$0]  (!%p1568_p2), %s246_s17, 2048, %s248_s16, %s236_s19, %s1928_s13, %s1928_s13, %s1927_s30  }
  0x29   : > { %259 = sbr.rel (%p1526_p8) target bundleno = 588 (0x24c), region = 44  ;;  %s1588_s9 = sand.u32 (!%p1526_p8), 1, %s1432_s22  }
  0x2a   : > { %s1061_s14 = sshll.u32 (!%p1526_p8), %s1588_s9, 7  ;;  %s262_s15 = scalar_lea.sflag (!%p1526_p8), [#allocation3], %s1588_s9 }
  0x2b   : > { %s1592_s7 = scalar_lea.vmem (!%p1526_p8), [#allocation2], %s1061_s14 }
  0x2e   : > { %1415 = dma.done.wait (%p1513_p4), %s262_s15, 2048  }
  0x2f   : > { %1417 = vsyncadd (%p1513_p4), %s262_s15, 4294965248 }
  0x30   : > { %1419 = dma.done.wait (%p44_p1), [#allocation6], 4096  }
  0x31   : > { %1421 = vsyncadd (%p44_p1), [#allocation6], 4294963200  ;;  %v338_v0 = vld [vmem:[#allocation5 + $0x78] sm:$0xff]  ;;  %v337_v1 = vld [vmem:[#allocation5 + $0x70] sm:$0xff]  ;;  %vm896_vm0 = vcmask 1041409   ;;  %vm898_vm1 = vcmask 1042434  }
  0x32   : > { %343 = vmatpush.msra.mxu0 %v338_v0  ;;  %1072 = vmatpush.msra.mxu2 %v338_v0  ;;  %v336_v2 = vld [vmem:[#allocation5 + $0x68] sm:$0xff]  ;;  %v335_v3 = vld [vmem:[#allocation5 + $0x60] sm:$0xff]  ;;  %v334_v4 = vld [vmem:[#allocation5 + $0x58] sm:$0xff]  ;;  %vm900_vm2 = vcmask 1043459   ;;  %vm902_vm3 = vcmask 1044484   ;;  %vm904_vm4 = vcmask 1045509  }
  0x33   : > { %1073 = vmatpush.msra.mxu3 %v338_v0  ;;  %v333_v5 = vld [vmem:[#allocation5 + $0x50] sm:$0xff]  ;;  %v332_v6 = vld [vmem:[#allocation5 + $0x48] sm:$0xff]  ;;  %v331_v7 = vld [vmem:[#allocation5 + $0x40] sm:$0xff]  ;;  %vm906_vm5 = vcmask 1046534   ;;  %vm908_vm6 = vcmask 1047559   ;;  %s1064_s20 = sshll.u32 %s1588_s9, 4 }
  0x34   : > { %344 = vmatpush.msra.mxu0 %v337_v1  ;;  %1074 = vmatpush.msra.mxu2 %v337_v1  ;;  %v330_v8 = vld [vmem:[#allocation5 + $0x38] sm:$0xff]  ;;  %v329_v9 = vld [vmem:[#allocation5 + $0x30] sm:$0xff]  ;;  %v328_v10 = vld [vmem:[#allocation5 + $0x28] sm:$0xff]  ;;  %s304_s11 = scalar_lea.vmem [#allocation8], %s1064_s20  ;;  %s1071_s12 = sshll.u32 %s1504_s25, 4 }
  0x35   : > { %1075 = vmatpush.msra.mxu3 %v337_v1  ;;  %v327_v11 = vld [vmem:[#allocation5 + $0x20] sm:$0xff]  ;;  %v326_v12 = vld [vmem:[#allocation5 + $0x18] sm:$0xff]  ;;  %v325_v13 = vld [vmem:[#allocation5 + $0x10] sm:$0xff]  ;;  %s956_s14 = scalar_lea.hbm %s1919_s6, %s1071_s12  ;;  %s957_s15 = sshll.u32 %s304_s11, 4  ;;  %s958_s15 = int_to_ptr.vmem [resolvable:$true] %s957_s15 }
  0x36   : > { %345 = vmatpush.msra.mxu0 %v336_v2  ;;  %1076 = vmatpush.msra.mxu2 %v336_v2  ;;  %v324_v14 = vld [vmem:[#allocation5 + $0x8] sm:$0xff]  ;;  %v323_v15 = vld [vmem:[#allocation5] sm:$0xff]  ;;  %v317_v21 = vld [vmem:[%s1592_s7 + $0x50] sm:$0xff]  ;;  %s945_s27 = scalar_lea.sflag [#allocation4], %s1588_s9  ;;  %s1390_s20 = scalar_lea.hbm %s1919_s6, 32 }
  0x37   : > { %1077 = vmatpush.msra.mxu3 %v336_v2  ;;  %v1603_v16 = vld [vmem:[%s1592_s7] sm:$0xff]  ;;  %v1609_v18 = vld [vmem:[%s1592_s7 + $0x48] sm:$0xff]  ;;  %v1624_v22 = vld [vmem:[%s1592_s7 + $0x10] sm:$0xff] }
  0x38   : > { %346 = vmatpush.msra.mxu0 %v335_v3  ;;  %1078 = vmatpush.msra.mxu2 %v335_v3  ;;  %v1606_v17 = vld [vmem:[%s1592_s7 + $0x20] sm:$0xff]  ;;  %v1615_v19 = vld [vmem:[%s1592_s7 + $0x8] sm:$0xff]  ;;  %v1627_v23 = vld [vmem:[%s1592_s7 + $0x30] sm:$0xff] }
  0x39   : > { %1079 = vmatpush.msra.mxu3 %v335_v3  ;;  %v1618_v20 = vld [vmem:[%s1592_s7 + $0x28] sm:$0xff]  ;;  %v318_v24 = vld [vmem:[%s1592_s7 + $0x58] sm:$0xff]  ;;  %v319_v27 = vld [vmem:[%s1592_s7 + $0x60] sm:$0xff] }
  0x3a   : > { %347 = vmatpush.msra.mxu0 %v334_v4  ;;  %1080 = vmatpush.msra.mxu2 %v334_v4  ;;  %v1633_v25 = vld [vmem:[%s1592_s7 + $0x18] sm:$0xff]  ;;  %v1642_v28 = vld [vmem:[%s1592_s7 + $0x40] sm:$0xff]  ;;  %v320_v29 = vld [vmem:[%s1592_s7 + $0x68] sm:$0xff] }
  0x3b   : > { %1081 = vmatpush.msra.mxu3 %v334_v4  ;;  %v1636_v26 = vld [vmem:[%s1592_s7 + $0x38] sm:$0xff]  ;;  %v321_v30 = vld [vmem:[%s1592_s7 + $0x70] sm:$0xff]  ;;  %v1651_v32 = vld [vmem:[%s1915_s2] ss:$0 sm:$0xff] }
  0x3c   : > { %348 = vmatpush.msra.mxu0 %v333_v5  ;;  %1082 = vmatpush.msra.mxu2 %v333_v5  ;;  %v322_v31 = vld [vmem:[%s1592_s7 + $0x78] sm:$0xff]  ;;  %v1657_v35 = vld [vmem:[%s1916_s3] ss:$0 sm:$0xff] }
  0x3d   : > { %1083 = vmatpush.msra.mxu3 %v333_v5 }
  0x3e   : > { %349 = vmatpush.msra.mxu0 %v332_v6  ;;  %1084 = vmatpush.msra.mxu2 %v332_v6 }
  0x3f   : > { %1085 = vmatpush.msra.mxu3 %v332_v6 }
  0x40   : > { %350 = vmatpush.msra.mxu0 %v331_v7  ;;  %1086 = vmatpush.msra.mxu2 %v331_v7 }
  0x41   : > { %1087 = vmatpush.msra.mxu3 %v331_v7 }
  0x42   : > { %351 = vmatpush.msra.mxu0 %v330_v8  ;;  %1088 = vmatpush.msra.mxu2 %v330_v8 }
  0x43   : > { %1089 = vmatpush.msra.mxu3 %v330_v8 }
  0x44   : > { %352 = vmatpush.msra.mxu0 %v329_v9  ;;  %1090 = vmatpush.msra.mxu2 %v329_v9 }
  0x45   : > { %1091 = vmatpush.msra.mxu3 %v329_v9 }
  0x46   : > { %353 = vmatpush.msra.mxu0 %v328_v10  ;;  %1092 = vmatpush.msra.mxu2 %v328_v10 }
  0x47   : > { %1093 = vmatpush.msra.mxu3 %v328_v10 }
  0x48   : > { %354 = vmatpush.msra.mxu0 %v327_v11  ;;  %1094 = vmatpush.msra.mxu2 %v327_v11 }
  0x49   : > { %1095 = vmatpush.msra.mxu3 %v327_v11 }
  0x4a   : > { %355 = vmatpush.msra.mxu0 %v326_v12  ;;  %1096 = vmatpush.msra.mxu2 %v326_v12 }
  0x4b   : > { %1097 = vmatpush.msra.mxu3 %v326_v12 }
  0x4c   : > { %356 = vmatpush.msra.mxu0 %v325_v13  ;;  %1098 = vmatpush.msra.mxu2 %v325_v13 }
  0x4d   : > { %1099 = vmatpush.msra.mxu3 %v325_v13 }
  0x4e   : > { %357 = vmatpush.msra.mxu0 %v324_v14  ;;  %1100 = vmatpush.msra.mxu2 %v324_v14 }
  0x4f   : > { %1101 = vmatpush.msra.mxu3 %v324_v14 }
  0x50   : > { %358 = vmatpush.msra.mxu0 %v323_v15  ;;  %1102 = vmatpush.msra.mxu2 %v323_v15 }
  0x51   : > { %1103 = vmatpush.msra.mxu3 %v323_v15  ;;  %359 = vmatmul.f32.vlgmr.msra.gmra.mxu0 %v1603_v16 }
  0x52   : > { %371 = vmatmul.f32.vlgmr.msra.gmra.mxu2 %v1606_v17  ;;  %386 = vmatmul.f32.vlgmr.msra.gmra.mxu3 %v1609_v18 }
  0x59   : > { %362 = vmatmul.f32.gmra.mxu0 %v1615_v19 }
  0x5a   : > { %374 = vmatmul.f32.gmra.mxu2 %v1618_v20  ;;  %389 = vmatmul.f32.gmra.mxu3 %v317_v21 }
  0x61   : > { %365 = vmatmul.f32.gmra.mxu0 %v1624_v22 }
  0x62   : > { %377 = vmatmul.f32.gmra.mxu2 %v1627_v23  ;;  %392 = vmatmul.f32.gmra.mxu3 %v318_v24 }
  0x69   : > { %368 = vmatmul.f32.gmra.mxu0 %v1633_v25 }
  0x6a   : > { %380 = vmatmul.f32.gmra.mxu2 %v1636_v26  ;;  %395 = vmatmul.f32.gmra.mxu3 %v319_v27 }
  0x72   : > { %383 = vmatmul.f32.gmra.mxu2 %v1642_v28  ;;  %398 = vmatmul.f32.gmra.mxu3 %v320_v29 }
  0x7a   : > { %401 = vmatmul.f32.gmra.mxu3 %v321_v30 }
  0x82   : > { %404 = vmatmul.f32.gmra.mxu3 %v322_v31 }
  0xce   : > { %v360_v33 = vpop.f32.mrf.mxu0 }
  0xcf   : > { %v361_v34 = vadd.f32 %v1651_v32, %v360_v33 }
  0xd1   : > { %1178 = vtanh.f32 %v361_v34 }
  0xd5   : > { %v372_v36 = vpop.f32.mrf.mxu2  ;;  %v387_v37 = vpop.f32.mrf.mxu3 }
  0xd6   : > { %v373_v38 = vadd.f32 %v1651_v32, %v372_v36  ;;  %v388_v39 = vadd.f32 %v1651_v32, %v387_v37  ;;  %v363_v40 = vpop.f32.mrf.mxu0 }
  0xd7   : > { %v1179_v41 = vpop.eup %1178  ;;  %v364_v43 = vadd.f32 %v1651_v32, %v363_v40 }
  0xd8   : > { %1180 = vtanh.f32 %v373_v38  ;;  %v428_v42 = vmul.f32 %v1179_v41, %v1657_v35 }
  0xd9   : > { %1182 = vtanh.f32 %v388_v39 }
  0xda   : > { %444 = vadd.xlane.f32.xlu0 %v428_v42  ;;  %1184 = vtanh.f32 %v364_v43 }
  0xdd   : > { %v375_v44 = vpop.f32.mrf.mxu2  ;;  %v390_v45 = vpop.f32.mrf.mxu3 }
  0xde   : > { %v1181_v46 = vpop.eup %1180  ;;  %v376_v47 = vadd.f32 %v1651_v32, %v375_v44  ;;  %v391_v48 = vadd.f32 %v1651_v32, %v390_v45  ;;  %v366_v49 = vpop.f32.mrf.mxu0 }
  0xdf   : > { %v1183_v50 = vpop.eup %1182  ;;  %v432_v51 = vmul.f32 %v1181_v46, %v1657_v35  ;;  %v367_v53 = vadd.f32 %v1651_v32, %v366_v49 }
  0xe0   : > { %1186 = vtanh.f32 %v376_v47  ;;  %v437_v52 = vmul.f32 %v1183_v50, %v1657_v35  ;;  %v1185_v54 = vpop.eup %1184 }
  0xe1   : > { %1188 = vtanh.f32 %v391_v48  ;;  %452 = vadd.xlane.f32.xlu2 %v432_v51  ;;  %v429_v60 = vmul.f32 %v1185_v54, %v1657_v35 }
  0xe2   : > { %462 = vadd.xlane.f32.xlu0 %v437_v52  ;;  %1190 = vtanh.f32 %v367_v53 }
  0xe5   : > { %v378_v55 = vpop.f32.mrf.mxu2  ;;  %v393_v56 = vpop.f32.mrf.mxu3 }
  0xe6   : > { %v1187_v57 = vpop.eup %1186  ;;  %v379_v58 = vadd.f32 %v1651_v32, %v378_v55  ;;  %v394_v59 = vadd.f32 %v1651_v32, %v393_v56  ;;  %v369_v61 = vpop.f32.mrf.mxu0 }
  0xe7   : > { %v1189_v62 = vpop.eup %1188  ;;  %v433_v63 = vmul.f32 %v1187_v57, %v1657_v35  ;;  %v370_v1 = vadd.f32 %v1651_v32, %v369_v61 }
  0xe8   : > { %1192 = vtanh.f32 %v379_v58  ;;  %v438_v0 = vmul.f32 %v1189_v62, %v1657_v35  ;;  %v1191_v2 = vpop.eup %1190 }
  0xe9   : > { %1194 = vtanh.f32 %v394_v59  ;;  %454 = vadd.xlane.f32.xlu2 %v433_v63  ;;  %v430_v7 = vmul.f32 %v1191_v2, %v1657_v35 }
  0xea   : > { %464 = vadd.xlane.f32.xlu1 %v438_v0  ;;  %446 = vadd.xlane.f32.xlu0 %v429_v60  ;;  %1196 = vtanh.f32 %v370_v1 }
  0xed   : > { %v381_v3 = vpop.f32.mrf.mxu2  ;;  %v396_v4 = vpop.f32.mrf.mxu3 }
  0xee   : > { %v1193_v5 = vpop.eup %1192  ;;  %v397_v6 = vadd.f32 %v1651_v32, %v396_v4  ;;  %v382_v11 = vadd.f32 %v1651_v32, %v381_v3 }
  0xef   : > { %v1195_v8 = vpop.eup %1194  ;;  %v434_v9 = vmul.f32 %v1193_v5, %v1657_v35 }
  0xf0   : > { %v439_v10 = vmul.f32 %v1195_v8, %v1657_v35  ;;  %1198 = vtanh.f32 %v397_v6  ;;  %v1197_v12 = vpop.eup %1196 }
  0xf1   : > { %1200 = vtanh.f32 %v382_v11  ;;  %v431_v21 = vmul.f32 %v1197_v12, %v1657_v35 }
  0xf2   : > { %466 = vadd.xlane.f32.xlu2 %v439_v10  ;;  %448 = vadd.xlane.f32.xlu1 %v430_v7 }
  0xf3   : > { %456 = vadd.xlane.f32.xlu0 %v434_v9 }
  0xf5   : > { %v384_v13 = vpop.f32.mrf.mxu2  ;;  %v399_v14 = vpop.f32.mrf.mxu3 }
  0xf6   : > { %v385_v15 = vadd.f32 %v1651_v32, %v384_v13  ;;  %v1199_v24 = vpop.eup %1198  ;;  %v400_v30 = vadd.f32 %v1651_v32, %v399_v14 }
  0xf7   : > { %v440_v27 = vmul.f32 %v1199_v24, %v1657_v35  ;;  %v1201_v29 = vpop.eup %1200 }
  0xf8   : > { %1202 = vtanh.f32 %v385_v15  ;;  %v435_v36 = vmul.f32 %v1201_v29, %v1657_v35 }
  0xf9   : > { %1204 = vtanh.f32 %v400_v30 }
  0xfa   : > { %450 = vadd.xlane.f32.xlu1 %v431_v21 }
  0xfb   : > { %468 = vadd.xlane.f32.xlu0 %v440_v27 }
  0xfd   : > { %v402_v31 = vpop.f32.mrf.mxu3 }
  0xfe   : > { %v1203_v33 = vpop.eup %1202  ;;  %v403_v34 = vadd.f32 %v1651_v32, %v402_v31 }
  0xff   : > { %v436_v37 = vmul.f32 %v1203_v33, %v1657_v35  ;;  %v1205_v38 = vpop.eup %1204 }
 0x100   : > { %1206 = vtanh.f32 %v403_v34  ;;  %v441_v43 = vmul.f32 %v1205_v38, %v1657_v35 }
 0x101   : > { %460 = vadd.xlane.f32.xlu2 %v436_v37 }
 0x102   : > { %458 = vadd.xlane.f32.xlu1 %v435_v36 }
 0x105   : > { %v405_v39 = vpop.f32.mrf.mxu3 }
 0x106   : > { %v1207_v40 = vpop.eup %1206  ;;  %v406_v41 = vadd.f32 %v1651_v32, %v405_v39 }
 0x107   : > { %v442_v42 = vmul.f32 %v1207_v40, %v1657_v35 }
 0x108   : > { %1208 = vtanh.f32 %v406_v41 }
 0x109   : > { %472 = vadd.xlane.f32.xlu2 %v442_v42 }
 0x10a   : > { %470 = vadd.xlane.f32.xlu1 %v441_v43 }
 0x10e   : > { %v1209_v44 = vpop.eup %1208 }
 0x10f   : > { %v443_v45 = vmul.f32 %v1209_v44, %v1657_v35 }
 0x111   : > { %474 = vadd.xlane.f32.xlu0 %v443_v45 }
 0x14d   : > { %v445_v46 = vpop.xlane.xlu0 %444 }
 0x14e   : > { %v476_v47 = vrot.slane %v445_v46, 4 }
 0x150   : > { %v477_v48 = vmax.f32 %v445_v46, %v476_v47 }
 0x152   : > { %v478_v49 = vrot.slane %v477_v48, 2 }
 0x154   : > { %v479_v50 = vmax.f32 %v477_v48, %v478_v49  ;;  %v453_v51 = vpop.xlane.xlu2 %452 }
 0x155   : > { %v500_v52 = vrot.slane %v453_v51, 4  ;;  %v463_v53 = vpop.xlane.xlu0 %462 }
 0x156   : > { %v480_v32 = vrot.slane %v479_v50, 1  ;;  %v530_v54 = vrot.slane %v463_v53, 4 }
 0x157   : > { %v501_v55 = vmax.f32 %v453_v51, %v500_v52 }
 0x158   : > { %v481_v56 = vmax.f32 %v479_v50, %v480_v32  ;;  %v531_v57 = vmax.f32 %v463_v53, %v530_v54 }
 0x159   : > { %v502_v58 = vrot.slane %v501_v55, 2 }
 0x15a   : > { %v572_v59 = vsub.f32 %v445_v46, %v481_v56  ;;  %v532_v60 = vrot.slane %v531_v57, 2 }
 0x15b   : > { %v503_v61 = vmax.f32 %v501_v55, %v502_v58 }
 0x15c   : > { %v588_v62 = vmul.f32 1.442695, %v572_v59  ;;  %v533_v35 = vmax.f32 %v531_v57, %v532_v60  ;;  %v455_v63 = vpop.xlane.xlu2 %454 }
 0x15d   : > { %v504_v0 = vrot.slane %v503_v61, 1  ;;  %v465_v1 = vpop.xlane.xlu1 %464  ;;  %v506_v2 = vrot.slane %v455_v63, 4  ;;  %v447_v3 = vpop.xlane.xlu0 %446 }
 0x15e   : > { %1210 = vpow2.f32 %v588_v62  ;;  %v534_v4 = vrot.slane %v533_v35, 1  ;;  %v536_v5 = vrot.slane %v465_v1, 4  ;;  %v482_v6 = vrot.slane %v447_v3, 4 }
 0x15f   : > { %v505_v7 = vmax.f32 %v503_v61, %v504_v0  ;;  %v507_v8 = vmax.f32 %v455_v63, %v506_v2 }
 0x160   : > { %v535_v9 = vmax.f32 %v533_v35, %v534_v4  ;;  %v537_v10 = vmax.f32 %v465_v1, %v536_v5  ;;  %v483_v11 = vmax.f32 %v447_v3, %v482_v6 }
 0x161   : > { %v576_v12 = vsub.f32 %v453_v51, %v505_v7  ;;  %v508_v13 = vrot.slane %v507_v8, 2 }
 0x162   : > { %v581_v14 = vsub.f32 %v463_v53, %v535_v9  ;;  %v538_v15 = vrot.slane %v537_v10, 2  ;;  %v484_v21 = vrot.slane %v483_v11, 2 }
 0x163   : > { %v596_v24 = vmul.f32 1.442695, %v576_v12  ;;  %v509_v27 = vmax.f32 %v507_v8, %v508_v13 }
 0x164   : > { %v1690_v29 = vpop.eup %1210  ;;  %v606_v30 = vmul.f32 1.442695, %v581_v14  ;;  %v539_v31 = vmax.f32 %v537_v10, %v538_v15  ;;  %v485_v33 = vmax.f32 %v483_v11, %v484_v21 }
 0x165   : > { %v620_v34 = vrot.slane %v1690_v29, 4  ;;  %1212 = vpow2.f32 %v596_v24  ;;  %v510_v36 = vrot.slane %v509_v27, 1  ;;  %v1693_v37 = vpop.xlane.xlu2 %466  ;;  %v1695_v38 = vpop.xlane.xlu1 %448 }
 0x166   : > { %1214 = vpow2.f32 %v606_v30  ;;  %v540_v39 = vrot.slane %v539_v31, 1  ;;  %v486_v40 = vrot.slane %v485_v33, 1  ;;  %v542_v41 = vrot.slane %v1693_v37, 4  ;;  %v1698_v42 = vpop.xlane.xlu0 %456 }
 0x167   : > { %v621_v43 = vadd.f32 %v1690_v29, %v620_v34  ;;  %v511_v44 = vmax.f32 %v509_v27, %v510_v36  ;;  %v488_v45 = vrot.slane %v1695_v38, 4  ;;  %v512_v46 = vrot.slane %v1698_v42, 4 }
 0x168   : > { %v541_v47 = vmax.f32 %v539_v31, %v540_v39  ;;  %v487_v48 = vmax.f32 %v485_v33, %v486_v40  ;;  %v543_v49 = vmax.f32 %v1693_v37, %v542_v41 }
 0x169   : > { %v622_v50 = vrot.slane %v621_v43, 2  ;;  %v577_v51 = vsub.f32 %v455_v63, %v511_v44  ;;  %v489_v52 = vmax.f32 %v1695_v38, %v488_v45  ;;  %v513_v53 = vmax.f32 %v1698_v42, %v512_v46 }
 0x16a   : > { %v582_v32 = vsub.f32 %v465_v1, %v541_v47  ;;  %v573_v54 = vsub.f32 %v447_v3, %v487_v48  ;;  %v544_v55 = vrot.slane %v543_v49, 2 }
 0x16b   : > { %v1706_v56 = vpop.eup %1212  ;;  %v623_v57 = vadd.f32 %v622_v50, %v621_v43  ;;  %v598_v58 = vmul.f32 1.442695, %v577_v51  ;;  %v490_v59 = vrot.slane %v489_v52, 2  ;;  %v514_v60 = vrot.slane %v513_v53, 2 }
 0x16c   : > { %v1708_v61 = vpop.eup %1214  ;;  %v644_v62 = vrot.slane %v1706_v56, 4  ;;  %v608_v35 = vmul.f32 1.442695, %v582_v32  ;;  %v590_v0 = vmul.f32 1.442695, %v573_v54  ;;  %v545_v63 = vmax.f32 %v543_v49, %v544_v55 }
 0x16d   : > { %v624_v2 = vrot.slane %v623_v57, 1  ;;  %v674_v4 = vrot.slane %v1708_v61, 4  ;;  %1216 = vpow2.f32 %v598_v58  ;;  %v491_v1 = vmax.f32 %v489_v52, %v490_v59  ;;  %v1712_v3 = vpop.xlane.xlu1 %450 }
 0x16e   : > { %v645_v5 = vadd.f32 %v1706_v56, %v644_v62  ;;  %1218 = vpow2.f32 %v608_v35  ;;  %v546_v6 = vrot.slane %v545_v63, 1  ;;  %v515_v7 = vmax.f32 %v513_v53, %v514_v60  ;;  %v1715_v8 = vpop.xlane.xlu0 %468 }
 0x16f   : > { %v625_v9 = vadd.f32 %v624_v2, %v623_v57  ;;  %v675_v10 = vadd.f32 %v1708_v61, %v674_v4  ;;  %1220 = vpow2.f32 %v590_v0  ;;  %v492_v11 = vrot.slane %v491_v1, 1 }
 0x170   : > { %v646_v12 = vrot.slane %v645_v5, 2  ;;  %v547_v13 = vmax.f32 %v545_v63, %v546_v6  ;;  %v516_v14 = vrot.slane %v515_v7, 1  ;;  %v494_v15 = vrot.slane %v1712_v3, 4 }
 0x171   : > { %1222 = vrcp.f32 %v625_v9  ;;  %v676_v21 = vrot.slane %v675_v10, 2  ;;  %v493_v24 = vmax.f32 %v491_v1, %v492_v11  ;;  %v548_v27 = vrot.slane %v1715_v8, 4 }
 0x172   : > { %v647_v30 = vadd.f32 %v646_v12, %v645_v5  ;;  %v583_v31 = vsub.f32 %v1693_v37, %v547_v13  ;;  %v517_v33 = vmax.f32 %v515_v7, %v516_v14  ;;  %v495_v34 = vmax.f32 %v1712_v3, %v494_v15  ;;  %v875_v15 = vld [vmem:[#allocation7 + $0x78] sm:$0xff] }
 0x173   : > { %v1722_v36 = vpop.eup %1216  ;;  %v677_v39 = vadd.f32 %v676_v21, %v675_v10  ;;  %v574_v40 = vsub.f32 %v1695_v38, %v493_v24  ;;  %v549_v41 = vmax.f32 %v1715_v8, %v548_v27  ;;  %919 = vmatpush.msra.mxu1 %v875_v15 }
 0x174   : > { %v1726_v43 = vpop.eup %1218  ;;  %v648_v44 = vrot.slane %v647_v30, 1  ;;  %v650_v45 = vrot.slane %v1722_v36, 4  ;;  %v610_v46 = vmul.f32 1.442695, %v583_v31  ;;  %v578_v47 = vsub.f32 %v1698_v42, %v517_v33  ;;  %v1737_v59 = vpop.xlane.xlu2 %460 }
 0x175   : > { %v1730_v48 = vpop.eup %1220  ;;  %v678_v37 = vrot.slane %v677_v39, 1  ;;  %v680_v49 = vrot.slane %v1726_v43, 4  ;;  %v592_v50 = vmul.f32 1.442695, %v574_v40  ;;  %v496_v51 = vrot.slane %v495_v34, 2  ;;  %v1739_v0 = vpop.xlane.xlu1 %458  ;;  %v874_v40 = vld [vmem:[#allocation7 + $0x70] sm:$0xff] }
 0x176   : > { %v649_v52 = vadd.f32 %v648_v44, %v647_v30  ;;  %v651_v38 = vadd.f32 %v1722_v36, %v650_v45  ;;  %v626_v53 = vrot.slane %v1730_v48, 4  ;;  %1224 = vpow2.f32 %v610_v46  ;;  %920 = vmatpush.msra.mxu1 %v874_v40 }
 0x177   : > { %v1223_v32 = vpop.eup %1222  ;;  %v681_v54 = vadd.f32 %v1726_v43, %v680_v49  ;;  %1226 = vpow2.f32 %v592_v50  ;;  %v600_v55 = vmul.f32 1.442695, %v578_v47  ;;  %v679_v57 = vadd.f32 %v678_v37, %v677_v39 }
 0x178   : > { %v652_v42 = vrot.slane %v651_v38, 2  ;;  %v627_v58 = vadd.f32 %v1730_v48, %v626_v53  ;;  %1228 = vrcp.f32 %v649_v52  ;;  %v497_v62 = vmax.f32 %v495_v34, %v496_v51  ;;  %v873_v51 = vld [vmem:[#allocation7 + $0x68] sm:$0xff] }
 0x179   : > { %v682_v60 = vrot.slane %v681_v54, 2  ;;  %v550_v35 = vrot.slane %v549_v41, 2  ;;  %v732_v63 = vmul.f32 %v1223_v32, %v1690_v29  ;;  %1230 = vpow2.f32 %v600_v55  ;;  %921 = vmatpush.msra.mxu1 %v873_v51 }
 0x17a   : > { %v628_v2 = vrot.slane %v627_v58, 2  ;;  %v653_v4 = vadd.f32 %v652_v42, %v651_v38  ;;  %v498_v1 = vrot.slane %v497_v62, 1  ;;  %v524_v6 = vrot.slane %v1737_v59, 4 }
 0x17b   : > { %v551_v5 = vmax.f32 %v549_v41, %v550_v35  ;;  %1232 = vrcp.f32 %v679_v57  ;;  %v683_v11 = vadd.f32 %v682_v60, %v681_v54  ;;  %v1749_v29 = vmul.f32 %v732_v63, %v1603_v16 }
 0x17c   : > { %v1743_v7 = vpop.eup %1224  ;;  %v629_v9 = vadd.f32 %v628_v2, %v627_v58  ;;  %v499_v13 = vmax.f32 %v497_v62, %v498_v1  ;;  %v525_v27 = vmax.f32 %v1737_v59, %v524_v6  ;;  %v654_v31 = vrot.slane %v653_v4, 1  ;;  %v1764_v32 = vpop.xlane.xlu2 %472  ;;  %v872_v58 = vld [vmem:[#allocation7 + $0x60] sm:$0xff] }
 0x17d   : > { %v1745_v10 = vpop.eup %1226  ;;  %v686_v12 = vrot.slane %v1743_v7, 4  ;;  %v552_v14 = vrot.slane %v551_v5, 1  ;;  %v518_v46 = vrot.slane %v1739_v0, 4  ;;  %v684_v47 = vrot.slane %v683_v11, 1  ;;  %v1769_v42 = vpop.xlane.xlu1 %470  ;;  %922 = vmatpush.msra.mxu1 %v872_v58 }
 0x17e   : > { %v630_v21 = vrot.slane %v629_v9, 1  ;;  %v632_v24 = vrot.slane %v1745_v10, 4  ;;  %v1753_v30 = vpop.eup %1228  ;;  %v575_v34 = vsub.f32 %v1712_v3, %v499_v13  ;;  %v526_v45 = vrot.slane %v525_v27, 2 }
 0x17f   : > { %v687_v33 = vadd.f32 %v1743_v7, %v686_v12  ;;  %v553_v39 = vmax.f32 %v551_v5, %v552_v14  ;;  %v1757_v41 = vpop.eup %1230  ;;  %v764_v3 = vrot.slane %v1749_v29, 4  ;;  %v1766_v54 = vadd.f32 %v654_v31, %v653_v4  ;;  %v871_v4 = vld [vmem:[#allocation7 + $0x58] sm:$0xff] }
 0x180   : > { %v631_v44 = vadd.f32 %v630_v21, %v629_v9  ;;  %v633_v16 = vadd.f32 %v1745_v10, %v632_v24  ;;  %v656_v49 = vrot.slane %v1757_v41, 4  ;;  %v594_v50 = vmul.f32 1.442695, %v575_v34  ;;  %923 = vmatpush.msra.mxu1 %v871_v4  ;;  %v870_v24 = vld [vmem:[#allocation7 + $0x50] sm:$0xff] }
 0x181   : > { %v688_v37 = vrot.slane %v687_v33, 2  ;;  %v1233_v52 = vpop.eup %1232  ;;  %v584_v53 = vsub.f32 %v1715_v8, %v553_v39  ;;  %v527_v57 = vmax.f32 %v525_v27, %v526_v45  ;;  %v519_v63 = vmax.f32 %v1739_v0, %v518_v46  ;;  %v869_v45 = vld [vmem:[#allocation7 + $0x48] sm:$0xff] }
 0x182   : > { %1234 = vrcp.f32 %v631_v44  ;;  %v634_v38 = vrot.slane %v633_v16, 2  ;;  %v657_v55 = vadd.f32 %v1757_v41, %v656_v49  ;;  %v685_v2 = vadd.f32 %v684_v47, %v683_v11  ;;  %924 = vmatpush.msra.mxu1 %v870_v24 }
 0x183   : > { %1236 = vpow2.f32 %v594_v50  ;;  %v689_v60 = vadd.f32 %v688_v37, %v687_v33  ;;  %v612_v35 = vmul.f32 1.442695, %v584_v53  ;;  %v528_v1 = vrot.slane %v527_v57, 1  ;;  %v867_v53 = vld [vmem:[#allocation7 + $0x38] sm:$0xff] }
 0x184   : > { %v635_v62 = vadd.f32 %v634_v38, %v633_v16  ;;  %v658_v8 = vrot.slane %v657_v55, 2  ;;  %v560_v5 = vrot.slane %v1764_v32, 4  ;;  %v520_v9 = vrot.slane %v519_v63, 2  ;;  %v1777_v39 = vpop.xlane.xlu0 %474  ;;  %925 = vmatpush.msra.mxu1 %v869_v45  ;;  %v868_v38 = vld [vmem:[#allocation7 + $0x40] sm:$0xff] }
 0x185   : > { %1238 = vpow2.f32 %v612_v35  ;;  %v554_v12 = vrot.slane %v1769_v42, 4  ;;  %v741_v13 = vmul.f32 %v1233_v52, %v1708_v61  ;;  %v529_v15 = vmax.f32 %v527_v57, %v528_v1 }
 0x186   : > { %v636_v6 = vrot.slane %v635_v62, 1  ;;  %v659_v14 = vadd.f32 %v658_v8, %v657_v55  ;;  %v561_v21 = vmax.f32 %v1764_v32, %v560_v5  ;;  %v690_v11 = vrot.slane %v689_v60, 1  ;;  %926 = vmatpush.msra.mxu1 %v868_v38 }
 0x187   : > { %v521_v33 = vmax.f32 %v519_v63, %v520_v9  ;;  %v555_v34 = vmax.f32 %v1769_v42, %v554_v12  ;;  %1240 = vrcp.f32 %v685_v2  ;;  %v580_v16 = vsub.f32 %v1737_v59, %v529_v15  ;;  %v866_v63 = vld [vmem:[#allocation7 + $0x30] sm:$0xff]  ;;  %v865_v9 = vld [vmem:[#allocation7 + $0x28] sm:$0xff] }
 0x188   : > { %v1235_v27 = vpop.eup %1234  ;;  %v637_v31 = vadd.f32 %v636_v6, %v635_v62  ;;  %v660_v61 = vrot.slane %v659_v14, 1  ;;  %v562_v37 = vrot.slane %v561_v21, 2  ;;  %v1785_v49 = vmul.f32 %v741_v13, %v1609_v18  ;;  %927 = vmatpush.msra.mxu1 %v867_v53 }
 0x189   : > { %v1779_v40 = vpop.eup %1236  ;;  %v733_v44 = vmul.f32 %v1235_v27, %v1730_v48  ;;  %v522_v47 = vrot.slane %v521_v33, 1  ;;  %v604_v50 = vmul.f32 1.442695, %v580_v16  ;;  %v556_v51 = vrot.slane %v555_v34, 2 }
 0x18a   : > { %1242 = vrcp.f32 %v637_v31  ;;  %v638_v46 = vrot.slane %v1779_v40, 4  ;;  %v566_v52 = vrot.slane %v1777_v39, 4  ;;  %v1790_v55 = vadd.f32 %v690_v11, %v689_v60  ;;  %928 = vmatpush.msra.mxu1 %v866_v63 }
 0x18b   : > { %v1788_v48 = vpop.eup %1238  ;;  %v523_v57 = vmax.f32 %v521_v33, %v522_v47  ;;  %v563_v58 = vmax.f32 %v561_v21, %v562_v37  ;;  %v749_v62 = vmul.f32 %v733_v44, %v1615_v19  ;;  %1244 = vpow2.f32 %v604_v50  ;;  %v864_v33 = vld [vmem:[#allocation7 + $0x20] sm:$0xff] }
 0x18c   : > { %v639_v59 = vadd.f32 %v1779_v40, %v638_v46  ;;  %v692_v18 = vrot.slane %v1788_v48, 4  ;;  %v557_v35 = vmax.f32 %v555_v34, %v556_v51  ;;  %v567_v5 = vmax.f32 %v1777_v39, %v566_v52  ;;  %929 = vmatpush.msra.mxu1 %v865_v9  ;;  %v863_v46 = vld [vmem:[#allocation7 + $0x18] sm:$0xff]  ;;  %v862_v52 = vld [vmem:[#allocation7 + $0x10] sm:$0xff] }
 0x18d   : > { %v579_v8 = vsub.f32 %v1739_v0, %v523_v57  ;;  %v564_v1 = vrot.slane %v563_v58, 1  ;;  %v1241_v60 = vpop.eup %1240  ;;  %v661_v12 = vadd.f32 %v660_v61, %v659_v14  ;;  %1246 = vrcp.f32 %v1766_v54 }
 0x18e   : > { %v640_v2 = vrot.slane %v639_v59, 2  ;;  %v693_v4 = vadd.f32 %v1788_v48, %v692_v18  ;;  %v558_v6 = vrot.slane %v557_v35, 1  ;;  %v736_v0 = vmul.f32 %v1753_v30, %v1706_v56  ;;  %930 = vmatpush.msra.mxu1 %v864_v33 }
 0x18f   : > { %v602_v15 = vmul.f32 1.442695, %v579_v8  ;;  %v565_v21 = vmax.f32 %v563_v58, %v564_v1  ;;  %v770_v24 = vrot.slane %v749_v62, 4  ;;  %v568_v31 = vrot.slane %v567_v5, 2  ;;  %v861_v58 = vld [vmem:[#allocation7 + $0x8] sm:$0xff]  ;;  %v860_v1 = vld [vmem:[#allocation7] sm:$0xff] }
 0x190   : > { %v1243_v19 = vpop.eup %1242  ;;  %v641_v13 = vadd.f32 %v640_v2, %v639_v59  ;;  %v694_v27 = vrot.slane %v693_v4, 2  ;;  %v559_v11 = vmax.f32 %v557_v35, %v558_v6  ;;  %v765_v38 = vadd.f32 %v764_v3, %v1749_v29  ;;  %931 = vmatpush.msra.mxu1 %v863_v46 }
 0x191   : > { %v734_v34 = vmul.f32 %v1243_v19, %v1745_v10  ;;  %1248 = vpow2.f32 %v602_v15  ;;  %v586_v14 = vsub.f32 %v1764_v32, %v565_v21  ;;  %v1803_v54 = vpop.eup %1244  ;;  %v569_v45 = vmax.f32 %v567_v5, %v568_v31 }
 0x192   : > { %v642_v44 = vrot.slane %v641_v13, 1  ;;  %v695_v61 = vadd.f32 %v694_v27, %v693_v4  ;;  %v585_v16 = vsub.f32 %v1769_v42, %v559_v11  ;;  %1250 = vrcp.f32 %v661_v12  ;;  %932 = vmatpush.msra.mxu1 %v862_v52 }
 0x193   : > { %v668_v30 = vrot.slane %v1803_v54, 4  ;;  %v616_v47 = vmul.f32 1.442695, %v586_v14  ;;  %v752_v10 = vmul.f32 %v736_v0, %v1606_v17  ;;  %v1247_v37 = vpop.eup %1246  ;;  %v570_v32 = vrot.slane %v569_v45, 1 }
 0x194   : > { %v643_v56 = vadd.f32 %v642_v44, %v641_v13  ;;  %v696_v50 = vrot.slane %v695_v61, 1  ;;  %v614_v51 = vmul.f32 1.442695, %v585_v16  ;;  %v750_v53 = vmul.f32 %v734_v34, %v1624_v22  ;;  %933 = vmatpush.msra.mxu1 %v861_v58 }
 0x195   : > { %v669_v42 = vadd.f32 %v1803_v54, %v668_v30  ;;  %v771_v59 = vadd.f32 %v770_v24, %v749_v62  ;;  %v571_v57 = vmax.f32 %v569_v45, %v570_v32  ;;  %v737_v17 = vmul.f32 %v1247_v37, %v1722_v36 }
 0x196   : > { %1252 = vrcp.f32 %v643_v56  ;;  %v766_v18 = vrot.slane %v765_v38, 2  ;;  %v697_v63 = vadd.f32 %v696_v50, %v695_v61  ;;  %v1817_v8 = vmul.f32 %v1241_v60, %v1726_v43  ;;  %934 = vmatpush.msra.mxu1 %v860_v1 }
 0x197   : > { %1254 = vpow2.f32 %v616_v47  ;;  %v1814_v35 = vpop.eup %1248  ;;  %v670_v2 = vrot.slane %v669_v42, 2  ;;  %v772_v29 = vrot.slane %v771_v59, 2  ;;  %v587_v62 = vsub.f32 %v1777_v39, %v571_v57 }
 0x198   : > { %1256 = vpow2.f32 %v614_v51  ;;  %v1251_v3 = vpop.eup %1250  ;;  %v662_v22 = vrot.slane %v1814_v35, 4  ;;  %v767_v5 = vadd.f32 %v766_v18, %v765_v38  ;;  %v776_v6 = vrot.slane %v750_v53, 4 }
 0x199   : > { %1258 = vrcp.f32 %v1790_v55  ;;  %v671_v36 = vadd.f32 %v670_v2, %v669_v42  ;;  %v738_v4 = vmul.f32 %v1251_v3, %v1757_v41  ;;  %v618_v12 = vmul.f32 1.442695, %v587_v62 }
 0x19a   : > { %v663_v9 = vadd.f32 %v1814_v35, %v662_v22  ;;  %v753_v19 = vmul.f32 %v737_v17, %v1618_v20  ;;  %v788_v43 = vrot.slane %v752_v10, 4  ;;  %1260 = vrcp.f32 %v697_v63 }
 0x19b   : > { %v672_v13 = vrot.slane %v671_v36, 1  ;;  %v773_v39 = vadd.f32 %v772_v29, %v771_v59  ;;  %v777_v15 = vadd.f32 %v776_v6, %v750_v53  ;;  %1262 = vpow2.f32 %v618_v12 }
 0x19c   : > { %v1253_v60 = vpop.eup %1252  ;;  %v664_v0 = vrot.slane %v663_v9, 2  ;;  %v768_v41 = vrot.slane %v767_v5, 1  ;;  %v754_v20 = vmul.f32 %v738_v4, %v1627_v23  ;;  %v789_v14 = vadd.f32 %v788_v43, %v752_v10 }
 0x19d   : > { %v1825_v21 = vpop.eup %1254  ;;  %v735_v55 = vmul.f32 %v1253_v60, %v1779_v40  ;;  %v673_v27 = vadd.f32 %v672_v13, %v671_v36  ;;  %v778_v31 = vrot.slane %v777_v15, 2  ;;  %v794_v45 = vrot.slane %v753_v19, 4 }
 0x19e   : > { %v1828_v24 = vpop.eup %1256  ;;  %v704_v11 = vrot.slane %v1825_v21, 4  ;;  %v665_v33 = vadd.f32 %v664_v0, %v663_v9  ;;  %v790_v47 = vrot.slane %v789_v14, 2  ;;  %v774_v50 = vrot.slane %v773_v39, 1 }
 0x19f   : > { %v698_v34 = vrot.slane %v1828_v24, 4  ;;  %v751_v44 = vmul.f32 %v735_v55, %v1633_v25  ;;  %v1259_v61 = vpop.eup %1258  ;;  %1264 = vrcp.f32 %v673_v27  ;;  %v779_v16 = vadd.f32 %v778_v31, %v777_v15 }
 0x1a0   : > { %v705_v40 = vadd.f32 %v1825_v21, %v704_v11  ;;  %v666_v56 = vrot.slane %v665_v33, 1  ;;  %v1261_v37 = vpop.eup %1260  ;;  %v795_v51 = vadd.f32 %v794_v45, %v753_v19  ;;  %v800_v32 = vrot.slane %v754_v20, 4 }
 0x1a1   : > { %v699_v46 = vadd.f32 %v1828_v24, %v698_v34  ;;  %v782_v30 = vrot.slane %v751_v44, 4  ;;  %v1836_v52 = vpop.eup %1262  ;;  %v780_v38 = vrot.slane %v779_v16, 1  ;;  %v791_v57 = vadd.f32 %v790_v47, %v789_v14 }
 0x1a2   : > { %v706_v23 = vrot.slane %v705_v40, 2  ;;  %v667_v10 = vadd.f32 %v666_v56, %v665_v33  ;;  %v710_v59 = vrot.slane %v1836_v52, 4  ;;  %v796_v58 = vrot.slane %v795_v51, 2 }
 0x1a3   : > { %v700_v25 = vrot.slane %v699_v46, 2  ;;  %v783_v42 = vadd.f32 %v782_v30, %v751_v44  ;;  %v769_v18 = vadd.f32 %v768_v41, %v767_v5  ;;  %v801_v62 = vadd.f32 %v800_v32, %v754_v20  ;;  %v1275_v30 = vld [vmem:[%s1592_s7 + $0x58] sm:$0xff] }
 0x1a4   : > { %v707_v53 = vadd.f32 %v706_v23, %v705_v40  ;;  %1266 = vrcp.f32 %v667_v10  ;;  %v711_v3 = vadd.f32 %v1836_v52, %v710_v59  ;;  %v797_v22 = vadd.f32 %v796_v58, %v795_v51 }
 0x1a5   : > { %v701_v17 = vadd.f32 %v700_v25, %v699_v46  ;;  %v784_v63 = vrot.slane %v783_v42, 2  ;;  %v1265_v2 = vpop.eup %1264  ;;  %v775_v4 = vadd.f32 %v774_v50, %v773_v39  ;;  %v781_v12 = vadd.f32 %v780_v38, %v779_v16  ;;  %v1274_v46 = vld [vmem:[%s1592_s7 + $0x50] sm:$0xff]  ;;  %v1276_v50 = vld [vmem:[%s1592_s7 + $0x60] sm:$0xff] }
 0x1a6   : > { %v708_v29 = vrot.slane %v707_v53, 1  ;;  %v740_v1 = vmul.f32 %v1265_v2, %v1803_v54  ;;  %v712_v9 = vrot.slane %v711_v3, 2  ;;  %v792_v19 = vrot.slane %v791_v57, 1 }
 0x1a7   : > { %v702_v36 = vrot.slane %v701_v17, 1  ;;  %v785_v6 = vadd.f32 %v784_v63, %v783_v42  ;;  %v802_v43 = vrot.slane %v801_v62, 2  ;;  %v798_v0 = vrot.slane %v797_v22, 1 }
 0x1a8   : > { %v756_v60 = vmul.f32 %v740_v1, %v1642_v28  ;;  %v709_v15 = vadd.f32 %v708_v29, %v707_v53  ;;  %v713_v55 = vadd.f32 %v712_v9, %v711_v3  ;;  %v897_v39 = vsel %vm896_vm0, %v775_v4, %v769_v18 }
 0x1a9   : > { %v703_v13 = vadd.f32 %v702_v36, %v701_v17  ;;  %v786_v5 = vrot.slane %v785_v6, 1  ;;  %v1842_v41 = vadd.f32 %v802_v43, %v801_v62  ;;  %v743_v11 = vmul.f32 %v1259_v61, %v1743_v7 }
 0x1aa   : > { %v1267_v27 = vpop.eup %1266  ;;  %v899_v28 = vsel %vm898_vm1, %v781_v12, %v897_v39  ;;  %v818_v31 = vrot.slane %v1785_v49, 4  ;;  %v812_v33 = vrot.slane %v756_v60, 4  ;;  %v793_v14 = vadd.f32 %v792_v19, %v791_v57  ;;  %v1277_v57 = vld [vmem:[%s1592_s7 + $0x68] sm:$0xff]  ;;  %v1278_v19 = vld [vmem:[%s1592_s7 + $0x70] sm:$0xff] }
 0x1ab   : > { %1268 = vrcp.f32 %v703_v13  ;;  %v787_v54 = vadd.f32 %v786_v5, %v785_v6  ;;  %v739_v20 = vmul.f32 %v1267_v27, %v1814_v35  ;;  %v799_v40 = vadd.f32 %v798_v0, %v797_v22 }
 0x1ac   : > { %v804_v7 = vrot.slane %v1842_v41, 1  ;;  %v714_v35 = vrot.slane %v713_v55, 1  ;;  %1270 = vrcp.f32 %v709_v15  ;;  %v744_v61 = vmul.f32 %v1261_v37, %v1788_v48 }
 0x1ad   : > { %v901_v34 = vsel %vm900_vm2, %v787_v54, %v899_v28  ;;  %v755_v44 = vmul.f32 %v739_v20, %v1636_v26  ;;  %v758_v56 = vmul.f32 %v1274_v46, %v1817_v8  ;;  %v759_v47 = vmul.f32 %v1275_v30, %v743_v11 }
 0x1ae   : > { %v903_v45 = vsel %vm902_vm3, %v793_v14, %v901_v34  ;;  %v715_v23 = vadd.f32 %v714_v35, %v713_v55  ;;  %v760_v51 = vmul.f32 %v1276_v50, %v744_v61  ;;  %v813_v32 = vadd.f32 %v812_v33, %v756_v60  ;;  %v1279_v34 = vld [vmem:[%s1592_s7 + $0x78] sm:$0xff]  ;;  %s959_s7 = sshll.u32 %s956_s14, 4  ;;  %s960_s7 = int_to_ptr.hbm [resolvable:$true] %s959_s7 }
 0x1af   : > { %v806_v16 = vrot.slane %v755_v44, 4  ;;  %v819_v25 = vadd.f32 %v818_v31, %v1785_v49  ;;  %v824_v37 = vrot.slane %v758_v56, 4  ;;  %v830_v38 = vrot.slane %v759_v47, 4  ;;  %s1384_s8 = sshra.s32 %s960_s7, 4  ;;  %s1385_s8 = int_to_ptr.hbm [resolvable:$true] %s1384_s8 }
 0x1b0   : > { %1272 = vrcp.f32 %v715_v23  ;;  %v814_v42 = vrot.slane %v813_v32, 2  ;;  %v836_v59 = vrot.slane %v760_v51, 4  ;;  %v905_v2 = vsel %vm904_vm4, %v799_v40, %v903_v45  ;;  %s1386_s16 = scalar_lea.hbm %s1385_s8, 16  ;;  %p1391_p11 = scmp.lt.s32.totalorder %s1385_s8, %s1919_s6 }
 0x1b1   : > { %v1269_v26 = vpop.eup %1268  ;;  %v807_v10 = vadd.f32 %v806_v16, %v755_v44  ;;  %v820_v53 = vrot.slane %v819_v25, 2  ;;  %v825_v17 = vadd.f32 %v824_v37, %v758_v56  ;;  %v831_v18 = vadd.f32 %v830_v38, %v759_v47  ;;  %p1387_p1 = scmp.ne.s32.totalorder %s1385_s8, %s1386_s16  ;;  %p1392_p2 = scmp.lt.s32.totalorder %s1390_s20, %s1386_s16 }
 0x1b2   : > { %v745_v48 = vmul.f32 %v1269_v26, %v1828_v24  ;;  %v1271_v63 = vpop.eup %1270  ;;  %v815_v29 = vadd.f32 %v814_v42, %v813_v32  ;;  %v837_v3 = vadd.f32 %v836_v59, %v760_v51  ;;  %v805_v15 = vadd.f32 %v804_v7, %v1842_v41 }
 0x1b3   : > { %v808_v8 = vrot.slane %v807_v10, 2  ;;  %v821_v49 = vadd.f32 %v820_v53, %v819_v25  ;;  %v746_v24 = vmul.f32 %v1271_v63, %v1825_v21  ;;  %v826_v62 = vrot.slane %v825_v17, 2  ;;  %p1388_p4 = pnand %p1387_p1, %p1555_p3  ;;  %p1393_p9 = por %p1392_p2, %p1391_p11 }
 0x1b4   : > { %v761_v58 = vmul.f32 %v1277_v57, %v745_v48  ;;  %v832_v1 = vrot.slane %v831_v18, 2  ;;  %v816_v36 = vrot.slane %v815_v29, 1  ;;  %v838_v6 = vrot.slane %v837_v3, 2 }
 0x1b5   : > { %v809_v22 = vadd.f32 %v808_v8, %v807_v10  ;;  %v822_v4 = vrot.slane %v821_v49, 1  ;;  %v762_v43 = vmul.f32 %v1278_v19, %v746_v24  ;;  %v827_v60 = vadd.f32 %v826_v62, %v825_v17  ;;  %v1177_v8 = vld [vmem:[%s1918_s5] ss:$0 sm:$0xff]  ;;  %p1389_p8 = pneg %p1388_p4 }
 0x1b6   : > { %v842_v9 = vrot.slane %v761_v58, 4  ;;  %v833_v13 = vadd.f32 %v832_v1, %v831_v18  ;;  %v1273_v5 = vpop.eup %1272  ;;  %v817_v55 = vadd.f32 %v816_v36, %v815_v29  ;;  %v907_v11 = vsel %vm906_vm5, %v805_v15, %v905_v2 }
 0x1b7   : > { %v810_v12 = vrot.slane %v809_v22, 1  ;;  %v747_v21 = vmul.f32 %v1273_v5, %v1836_v52  ;;  %v823_v54 = vadd.f32 %v822_v4, %v821_v49  ;;  %v828_v39 = vrot.slane %v827_v60, 1  ;;  %p1394_p10 = pnand %p1393_p9, %p1389_p8 }
 0x1b8   : > { %v843_v0 = vadd.f32 %v842_v9, %v761_v58  ;;  %v839_v20 = vadd.f32 %v838_v6, %v837_v3  ;;  %v848_v31 = vrot.slane %v762_v43, 4  ;;  %v834_v14 = vrot.slane %v833_v13, 1 }
 0x1b9   : > { %v811_v27 = vadd.f32 %v810_v12, %v809_v22  ;;  %v763_v44 = vmul.f32 %v1279_v34, %v747_v21  ;;  %v910_v41 = vsel %vm896_vm0, %v823_v54, %v817_v55  ;;  %v829_v40 = vadd.f32 %v828_v39, %v827_v60 }
 0x1ba   : > { %v844_v28 = vrot.slane %v843_v0, 2  ;;  %v849_v35 = vadd.f32 %v848_v31, %v762_v43  ;;  %v840_v52 = vrot.slane %v839_v20, 1  ;;  %v835_v56 = vadd.f32 %v834_v14, %v833_v13 }
 0x1bb   : > { %v909_v33 = vsel %vm908_vm6, %v811_v27, %v907_v11  ;;  %v854_v61 = vrot.slane %v763_v44, 4  ;;  %v911_v46 = vsel %vm898_vm1, %v829_v40, %v910_v41 }
 0x1bc   : > { %935 = vmatmul.f32.vlgmr.msra.gmra.mxu1 %v909_v33  ;;  %v845_v7 = vadd.f32 %v844_v28, %v843_v0  ;;  %v850_v45 = vrot.slane %v849_v35, 2  ;;  %v912_v50 = vsel %vm900_vm2, %v835_v56, %v911_v46  ;;  %v841_v51 = vadd.f32 %v840_v52, %v839_v20 }
 0x1bd   : > { %v855_v30 = vadd.f32 %v854_v61, %v763_v44 }
 0x1be   : > { %v846_v16 = vrot.slane %v845_v7, 1  ;;  %v851_v47 = vadd.f32 %v850_v45, %v849_v35  ;;  %v913_v48 = vsel %vm902_vm3, %v841_v51, %v912_v50 }
 0x1bf   : > { %v856_v23 = vrot.slane %v855_v30, 2 }
 0x1c0   : > { %v847_v26 = vadd.f32 %v846_v16, %v845_v7  ;;  %v852_v32 = vrot.slane %v851_v47, 1 }
 0x1c1   : > { %v857_v25 = vadd.f32 %v856_v23, %v855_v30 }
 0x1c2   : > { %v853_v10 = vadd.f32 %v852_v32, %v851_v47  ;;  %v914_v38 = vsel %vm904_vm4, %v847_v26, %v913_v48 }
 0x1c3   : > { %v858_v37 = vrot.slane %v857_v25, 1 }
 0x1c4   : > { %v915_v53 = vsel %vm906_vm5, %v853_v10, %v914_v38 }
 0x1c5   : > { %v859_v42 = vadd.f32 %v858_v37, %v857_v25 }
 0x1c7   : > { %v916_v59 = vsel %vm908_vm6, %v859_v42, %v915_v53 }
 0x1c8   : > { %938 = vmatmul.f32.gmra.mxu1 %v916_v59 }
 0x239   : > { %v936_v57 = vpop.f32.mrf.mxu1 }
 0x23a   : > { %v937_v58 = vadd.f32 %v1177_v8, %v936_v57 }
 0x23c   : > { %942 = vst [vmem:[%s304_s11] sm:$0xff] %v937_v58 }
 0x245   : > { %v939_v17 = vpop.f32.mrf.mxu1 }
 0x246   : > { %v940_v18 = vadd.f32 %v1177_v8, %v939_v17 }
 0x248   : > { %943 = vst [vmem:[%s304_s11 + $0x8] sm:$0xff] %v940_v18 }
 0x249   : > { %1397 = shalt.err (!%p1394_p10)
}
 0x24a   : > { %s1446_s9 = smov 128   ;;  %s1447_s11 = smov 8  }
 0x24b   : > { %1114 = dma.vmem_to_hbm [thread:$0]  (%p1555_p3), %s958_s15, 256, %s960_s7, %s945_s27, %s1446_s9, %s1446_s9, %s1447_s11  }
 0x24c PF: > { %s974_s12 = sand.u32 1, %s1428_s21   ;;  %p1929_p12 = scmp.ge.s32.totalorder %s1440_s24, 2 }
 0x24d   : > { %s975_s30 = scalar_lea.sflag [#allocation4], %s974_s12 }
 0x24e   : > { %p1128_p13 = pnand %p1929_p12, %p1518_p6 }
 0x250   : > { %p1129_p0 = pneg %p1128_p13 }
 0x252   : > { %1423 = dma.done.wait (%p1129_p0), %s975_s30, 256  }
 0x253   : > { %1425 = vsyncadd (%p1129_p0), %s975_s30, 4294967040  ;;  %p20_p5 = scmp.ge.s32.totalorder %s1545_s18, 4   ;;  %s1930_s21 = smov %s1432_s22 }
 0x254   : > { %s1931_s22 = smov %s1436_s23  ;;  %s1932_s23 = smov %s1561_s29 }
 0x255   : > { %s1933_s24 = smov %s1545_s18  ;;  %22 = sbr.rel (!%p20_p5) target bundleno = 6 (0x6), region = 97 }
 0x25a   :  { %981 = vsyncpa [#allocation3], 1 }
 0x25b   :  { %983 = vsyncpa [#allocation3 + $0x1], 1 }
 0x25c   :  { %984 = vsyncpa [#allocation6], 1 }
 0x25d   :  { %985 = vsyncpa [#allocation4], 1 }
 0x25e   :  { %987 = vsyncpa [#allocation4 + $0x1], 1 }

</bundles_post_ra>
